<compile_context>
chip_gen: v5e
topology: v5e:2x2
jax: 0.10.0
libtpu: 0.0.40
codegen_flags: <defaults>
</compile_context>

<pallas_src>
import math
import jax
import jax.numpy as jnp
from jax.experimental import pallas as pl
from jax.experimental.pallas import tpu as pltpu

# ---- model hyper-params (small, consistent with Block(dim, num_heads)) ----
B = 2          # batch
N = 8          # tokens per sequence
DIM = 32       # embedding dim
NUM_HEADS = 4
HEAD_DIM = DIM // NUM_HEADS
MLP_RATIO = 4.0
HIDDEN = int(DIM * MLP_RATIO)   # 128
LN_EPS = 1e-5
BN = B * N                      # flattened token rows
NEG_INF = -1e30


def _layernorm(x, gamma, beta):
    # x: (rows, C), gamma/beta: (1, C)
    mean = jnp.mean(x, axis=-1, keepdims=True)
    xc = x - mean
    var = jnp.mean(xc * xc, axis=-1, keepdims=True)
    inv = jax.lax.rsqrt(var + LN_EPS)
    return xc * inv * gamma + beta


def _gelu_exact(x):
    # PyTorch nn.GELU() default = exact erf formulation (kept for parity).
    return 0.5 * x * (1.0 + jax.lax.erf(x * (1.0 / math.sqrt(2.0))))


def block_kernel(x_ref, bias_ref,
                 ln1_g_ref, ln1_b_ref,
                 wqkv_t_ref,
                 proj_w_ref, proj_b_ref,
                 ln2_g_ref, ln2_b_ref,
                 fc1_w_ref, fc1_b_ref,
                 fc2_w_ref, fc2_b_ref,
                 o_ref):
    x = x_ref[...]                                            # (BN, DIM) f32

    # ---------------- Attention branch ----------------
    h = _layernorm(x, ln1_g_ref[...], ln1_b_ref[...])         # norm1
    h_t = h.T                                                 # (DIM, BN)

    # Single fused QKV matmul; scale already folded into the Q rows.
    qkv_t = jnp.dot(wqkv_t_ref[...], h_t,
                    preferred_element_type=jnp.float32)       # (3*DIM, BN)

    # Free sublane-aligned split: (96, BN) -> (3, H, HD, BN).
    qkv3 = qkv_t.reshape(3, NUM_HEADS, HEAD_DIM, BN)
    q4 = qkv3[0]                                              # (H, HD, BN), pre-scaled
    k4 = qkv3[1]                                              # (H, HD, BN)
    v4 = qkv3[2]                                              # (H, HD, BN)

    # One head-batched contraction over HEAD_DIM for all heads at once.
    scores = jnp.einsum('hdn,hdm->hnm', q4, k4,
                        preferred_element_type=jnp.float32)   # (H, BN, BN)

    # Block-diagonal bias (precomputed wrapper-side): tokens only attend
    # within their own sequence of the flattened (B*N) token axis.
    scores = scores + bias_ref[...][None, :, :]

    # One fused softmax over the whole (H, BN, BN) tensor.
    scores = scores - jnp.max(scores, axis=-1, keepdims=True)
    p = jnp.exp(scores)
    denom = jnp.sum(p, axis=-1, keepdims=True)
    p = p * pl.reciprocal(denom, approx=True)                 # EUP reciprocal

    # Single head-batched P·V contraction, direct dot_general output order:
    # out_t[h, d, n] = sum_m v4[h, d, m] * p[h, n, m]
    out_t = jnp.einsum('hdm,hnm->hdn', v4, p,
                       preferred_element_type=jnp.float32)    # (H, HD, BN)

    # Free (H, HD, BN) -> (DIM, BN) merge, then one 2-D transpose to row-major.
    attn = out_t.reshape(DIM, BN).T                           # (BN, DIM)

    attn = jnp.dot(attn, proj_w_ref[...],
                   preferred_element_type=jnp.float32) + proj_b_ref[...]       # proj
    x = x + attn                                              # residual 1

    # ---------------- MLP branch ----------------
    h2 = _layernorm(x, ln2_g_ref[...], ln2_b_ref[...])        # norm2
    z = jnp.dot(h2, fc1_w_ref[...],
                preferred_element_type=jnp.float32) + fc1_b_ref[...]           # (BN, HIDDEN)
    z = _gelu_exact(z)
    z = jnp.dot(z, fc2_w_ref[...],
                preferred_element_type=jnp.float32) + fc2_b_ref[...]           # (BN, DIM)
    o_ref[...] = x + z                                        # residual 2


@jax.jit
def block_forward(x, params):
    (ln1_g, ln1_b, qkv_w, proj_w, proj_b,
     ln2_g, ln2_b, fc1_w, fc1_b, fc2_w, fc2_b) = params

    # Fused, pre-transposed QKV weight with the softmax scale folded into Q:
    # qkv_t = wqkv_t @ h^T, rows [0:DIM]=Q (scaled), [DIM:2DIM]=K, [2DIM:]=V.
    scale = 1.0 / math.sqrt(HEAD_DIM)
    wqkv_t = jnp.concatenate(
        [qkv_w[:, 0 * DIM:1 * DIM].T * scale,
         qkv_w[:, 1 * DIM:2 * DIM].T,
         qkv_w[:, 2 * DIM:3 * DIM].T], axis=0)                # (3*DIM, DIM)

    # Compile-time-constant block-diagonal attention bias over flattened rows.
    seq_id = jnp.arange(BN, dtype=jnp.int32) // N
    bias = jnp.where(seq_id[:, None] == seq_id[None, :],
                     0.0, NEG_INF).astype(jnp.float32)        # (BN, BN)

    x2d = x.reshape(BN, DIM)                                  # flatten (B, N) -> rows

    vmem = pl.BlockSpec(memory_space=pltpu.MemorySpace.VMEM)
    out2d = pl.pallas_call(
        block_kernel,
        out_shape=jax.ShapeDtypeStruct((BN, DIM), jnp.float32),
        in_specs=[vmem] * 13,
        out_specs=vmem,
    )(x2d, bias, ln1_g, ln1_b, wqkv_t, proj_w, proj_b,
      ln2_g, ln2_b, fc1_w, fc1_b, fc2_w, fc2_b)
    return out2d.reshape(B, N, DIM)


def reference_forward(x, params):
    (ln1_g, ln1_b, qkv_w, proj_w, proj_b,
     ln2_g, ln2_b, fc1_w, fc1_b, fc2_w, fc2_b) = params

    def ln(t, g, b):
        m = jnp.mean(t, -1, keepdims=True)
        v = jnp.mean((t - m) ** 2, -1, keepdims=True)
        return (t - m) / jnp.sqrt(v + LN_EPS) * g + b

    h = ln(x, ln1_g, ln1_b)
    qkv = h @ qkv_w                                          # (B, N, 3*DIM)
    qkv = qkv.reshape(B, N, 3, NUM_HEADS, HEAD_DIM).transpose(2, 0, 3, 1, 4)
    q, k, v = qkv[0], qkv[1], qkv[2]                         # (B, H, N, hd)
    scores = jnp.einsum('bhnd,bhmd->bhnm', q, k) / math.sqrt(HEAD_DIM)
    p = jax.nn.softmax(scores, axis=-1)
    a = jnp.einsum('bhnm,bhmd->bhnd', p, v)
    a = a.transpose(0, 2, 1, 3).reshape(B, N, DIM)
    a = a @ proj_w + proj_b
    x = x + a
    h2 = ln(x, ln2_g, ln2_b)
    z = h2 @ fc1_w + fc1_b
    z = 0.5 * z * (1.0 + jax.lax.erf(z / math.sqrt(2.0)))
    z = z @ fc2_w + fc2_b
    return x + z


def init_params(key):
    ks = jax.random.split(key, 6)
    s = 0.05
    ln1_g = jnp.ones((1, DIM), jnp.float32)
    ln1_b = jnp.zeros((1, DIM), jnp.float32)
    qkv_w = s * jax.random.normal(ks[0], (DIM, 3 * DIM), jnp.float32)
    proj_w = s * jax.random.normal(ks[1], (DIM, DIM), jnp.float32)
    proj_b = s * jax.random.normal(ks[2], (1, DIM), jnp.float32)
    ln2_g = jnp.ones((1, DIM), jnp.float32)
    ln2_b = jnp.zeros((1, DIM), jnp.float32)
    fc1_w = s * jax.random.normal(ks[3], (DIM, HIDDEN), jnp.float32)
    fc1_b = s * jax.random.normal(ks[4], (1, HIDDEN), jnp.float32)
    fc2_w = s * jax.random.normal(ks[5], (HIDDEN, DIM), jnp.float32)
    fc2_b = jnp.zeros((1, DIM), jnp.float32)
    return (ln1_g, ln1_b, qkv_w, proj_w, proj_b,
            ln2_g, ln2_b, fc1_w, fc1_b, fc2_w, fc2_b)


if __name__ == "__main__":
    key = jax.random.PRNGKey(0)
    kx, kp = jax.random.split(key)
    x = jax.random.normal(kx, (B, N, DIM), jnp.float32)
    params = init_params(kp)

    out = block_forward(x, params)
    out = jax.block_until_ready(out)

    ref = reference_forward(x, params)
    assert out.shape == (B, N, DIM)
    err = jnp.max(jnp.abs(out - ref))
    assert jnp.allclose(out, ref, atol=1e-3, rtol=1e-3), f"max abs err {err}"
    print("KERNEL_OK")
</pallas_src>

<mosaic_0001>
module attributes {stable_mosaic.version = 11 : i64} {
  func.func @block_kernel(%arg0: memref<16x32xf32, #tpu.memory_space<vmem>>, %arg1: memref<16x16xf32, #tpu.memory_space<vmem>>, %arg2: memref<1x32xf32, #tpu.memory_space<vmem>>, %arg3: memref<1x32xf32, #tpu.memory_space<vmem>>, %arg4: memref<96x32xf32, #tpu.memory_space<vmem>>, %arg5: memref<32x32xf32, #tpu.memory_space<vmem>>, %arg6: memref<1x32xf32, #tpu.memory_space<vmem>>, %arg7: memref<1x32xf32, #tpu.memory_space<vmem>>, %arg8: memref<1x32xf32, #tpu.memory_space<vmem>>, %arg9: memref<32x128xf32, #tpu.memory_space<vmem>>, %arg10: memref<1x128xf32, #tpu.memory_space<vmem>>, %arg11: memref<128x32xf32, #tpu.memory_space<vmem>>, %arg12: memref<1x32xf32, #tpu.memory_space<vmem>>, %arg13: memref<16x32xf32, #tpu.memory_space<vmem>>) attributes {dimension_semantics = [], scalar_prefetch = 0 : i64, scratch_operands = 0 : i64, tpu.core_type = #tpu.core_type<tc>} {
    %c0 = arith.constant 0 : index
    %c0_0 = arith.constant 0 : index
    %0 = vector.load %arg0[%c0, %c0_0] : memref<16x32xf32, #tpu.memory_space<vmem>>, vector<16x32xf32>
    %c0_1 = arith.constant 0 : index
    %c0_2 = arith.constant 0 : index
    %1 = vector.load %arg2[%c0_1, %c0_2] : memref<1x32xf32, #tpu.memory_space<vmem>>, vector<1x32xf32>
    %c0_3 = arith.constant 0 : index
    %c0_4 = arith.constant 0 : index
    %2 = vector.load %arg3[%c0_3, %c0_4] : memref<1x32xf32, #tpu.memory_space<vmem>>, vector<1x32xf32>
    %cst = arith.constant dense<0.000000e+00> : vector<16xf32>
    %3 = vector.multi_reduction <add>, %0, %cst [1] : vector<16x32xf32> to vector<16xf32>
    %4 = vector.shape_cast %3 : vector<16xf32> to vector<16x1xf32>
    %cst_5 = arith.constant 3.200000e+01 : f32
    %5 = vector.broadcast %cst_5 : f32 to vector<16x1xf32>
    %6 = arith.divf %4, %5 : vector<16x1xf32>
    %7 = vector.broadcast %6 : vector<16x1xf32> to vector<16x32xf32>
    %8 = arith.subf %0, %7 : vector<16x32xf32>
    %9 = arith.mulf %8, %8 : vector<16x32xf32>
    %cst_6 = arith.constant dense<0.000000e+00> : vector<16xf32>
    %10 = vector.multi_reduction <add>, %9, %cst_6 [1] : vector<16x32xf32> to vector<16xf32>
    %11 = vector.shape_cast %10 : vector<16xf32> to vector<16x1xf32>
    %cst_7 = arith.constant 3.200000e+01 : f32
    %12 = vector.broadcast %cst_7 : f32 to vector<16x1xf32>
    %13 = arith.divf %11, %12 : vector<16x1xf32>
    %cst_8 = arith.constant 9.99999974E-6 : f32
    %14 = vector.broadcast %cst_8 : f32 to vector<16x1xf32>
    %15 = arith.addf %13, %14 : vector<16x1xf32>
    %16 = math.rsqrt %15 : vector<16x1xf32>
    %17 = vector.broadcast %16 : vector<16x1xf32> to vector<16x32xf32>
    %18 = arith.mulf %8, %17 : vector<16x32xf32>
    %19 = vector.broadcast %1 : vector<1x32xf32> to vector<16x32xf32>
    %20 = arith.mulf %18, %19 : vector<16x32xf32>
    %21 = vector.broadcast %2 : vector<1x32xf32> to vector<16x32xf32>
    %22 = arith.addf %20, %21 : vector<16x32xf32>
    %23 = tpu.transpose %22, [1, 0] : vector<16x32xf32> -> vector<32x16xf32>
    %c0_9 = arith.constant 0 : index
    %c0_10 = arith.constant 0 : index
    %24 = vector.load %arg4[%c0_9, %c0_10] : memref<96x32xf32, #tpu.memory_space<vmem>>, vector<96x32xf32>
    %cst_11 = arith.constant dense<0.000000e+00> : vector<96x16xf32>
    %25 = tpu.matmul %24, %23, %cst_11 {dimension_numbers = #tpu.dot_dimension_numbers<[1], [0], [0], [1], [0, 0, 1, 1], [], []>} : vector<96x32xf32>, vector<32x16xf32>, vector<96x16xf32> -> vector<96x16xf32>
    %26 = vector.shape_cast %25 : vector<96x16xf32> to vector<3x4x8x16xf32>
    %27 = vector.extract_strided_slice %26 {offsets = [0, 0, 0, 0], sizes = [1, 4, 8, 16], strides = [1, 1, 1, 1]} : vector<3x4x8x16xf32> to vector<1x4x8x16xf32>
    %28 = vector.shape_cast %27 : vector<1x4x8x16xf32> to vector<4x8x16xf32>
    %29 = vector.extract_strided_slice %26 {offsets = [1, 0, 0, 0], sizes = [1, 4, 8, 16], strides = [1, 1, 1, 1]} : vector<3x4x8x16xf32> to vector<1x4x8x16xf32>
    %30 = vector.shape_cast %29 : vector<1x4x8x16xf32> to vector<4x8x16xf32>
    %31 = vector.extract_strided_slice %26 {offsets = [2, 0, 0, 0], sizes = [1, 4, 8, 16], strides = [1, 1, 1, 1]} : vector<3x4x8x16xf32> to vector<1x4x8x16xf32>
    %32 = vector.shape_cast %31 : vector<1x4x8x16xf32> to vector<4x8x16xf32>
    "tpu.trace_start"() <{level = 10 : i32, message = "hdn,hdm->hnm"}> : () -> ()
    %cst_12 = arith.constant dense<0.000000e+00> : vector<4x16x16xf32>
    %33 = tpu.matmul %28, %30, %cst_12 {dimension_numbers = #tpu.dot_dimension_numbers<[1], [1], [2], [2], [0, 0, 0, 2, 1, 2], [0], [0]>} : vector<4x8x16xf32>, vector<4x8x16xf32>, vector<4x16x16xf32> -> vector<4x16x16xf32>
    "tpu.trace_stop"() : () -> ()
    %c0_13 = arith.constant 0 : index
    %c0_14 = arith.constant 0 : index
    %34 = vector.load %arg1[%c0_13, %c0_14] : memref<16x16xf32, #tpu.memory_space<vmem>>, vector<16x16xf32>
    %35 = vector.shape_cast %34 : vector<16x16xf32> to vector<1x16x16xf32>
    %36 = vector.broadcast %35 : vector<1x16x16xf32> to vector<4x16x16xf32>
    %37 = arith.addf %33, %36 : vector<4x16x16xf32>
    %cst_15 = arith.constant dense<0xFF800000> : vector<4x16xf32>
    %38 = vector.multi_reduction <maximumf>, %37, %cst_15 [2] : vector<4x16x16xf32> to vector<4x16xf32>
    %39 = vector.shape_cast %38 : vector<4x16xf32> to vector<4x16x1xf32>
    %40 = vector.broadcast %39 : vector<4x16x1xf32> to vector<4x16x16xf32>
    %41 = arith.subf %37, %40 : vector<4x16x16xf32>
    %42 = math.exp %41 : vector<4x16x16xf32>
    %cst_16 = arith.constant dense<0.000000e+00> : vector<4x16xf32>
    %43 = vector.multi_reduction <add>, %42, %cst_16 [2] : vector<4x16x16xf32> to vector<4x16xf32>
    %44 = vector.shape_cast %43 : vector<4x16xf32> to vector<4x16x1xf32>
    %45 = tpu.reciprocal %44 {approx = true} : vector<4x16x1xf32> -> vector<4x16x1xf32>
    %46 = vector.broadcast %45 : vector<4x16x1xf32> to vector<4x16x16xf32>
    %47 = arith.mulf %42, %46 : vector<4x16x16xf32>
    "tpu.trace_start"() <{level = 10 : i32, message = "hdm,hnm->hdn"}> : () -> ()
    %cst_17 = arith.constant dense<0.000000e+00> : vector<4x8x16xf32>
    %48 = tpu.matmul %32, %47, %cst_17 {dimension_numbers = #tpu.dot_dimension_numbers<[2], [2], [1], [1], [0, 0, 0, 1, 1, 1], [0], [0]>} : vector<4x8x16xf32>, vector<4x16x16xf32>, vector<4x8x16xf32> -> vector<4x8x16xf32>
    "tpu.trace_stop"() : () -> ()
    %49 = vector.shape_cast %48 : vector<4x8x16xf32> to vector<32x16xf32>
    %50 = tpu.transpose %49, [1, 0] : vector<32x16xf32> -> vector<16x32xf32>
    %c0_18 = arith.constant 0 : index
    %c0_19 = arith.constant 0 : index
    %51 = vector.load %arg5[%c0_18, %c0_19] : memref<32x32xf32, #tpu.memory_space<vmem>>, vector<32x32xf32>
    %cst_20 = arith.constant dense<0.000000e+00> : vector<16x32xf32>
    %52 = tpu.matmul %50, %51, %cst_20 {dimension_numbers = #tpu.dot_dimension_numbers<[1], [0], [0], [1], [0, 0, 1, 1], [], []>} : vector<16x32xf32>, vector<32x32xf32>, vector<16x32xf32> -> vector<16x32xf32>
    %c0_21 = arith.constant 0 : index
    %c0_22 = arith.constant 0 : index
    %53 = vector.load %arg6[%c0_21, %c0_22] : memref<1x32xf32, #tpu.memory_space<vmem>>, vector<1x32xf32>
    %54 = vector.broadcast %53 : vector<1x32xf32> to vector<16x32xf32>
    %55 = arith.addf %52, %54 : vector<16x32xf32>
    %56 = arith.addf %0, %55 : vector<16x32xf32>
    %c0_23 = arith.constant 0 : index
    %c0_24 = arith.constant 0 : index
    %57 = vector.load %arg7[%c0_23, %c0_24] : memref<1x32xf32, #tpu.memory_space<vmem>>, vector<1x32xf32>
    %c0_25 = arith.constant 0 : index
    %c0_26 = arith.constant 0 : index
    %58 = vector.load %arg8[%c0_25, %c0_26] : memref<1x32xf32, #tpu.memory_space<vmem>>, vector<1x32xf32>
    %cst_27 = arith.constant dense<0.000000e+00> : vector<16xf32>
    %59 = vector.multi_reduction <add>, %56, %cst_27 [1] : vector<16x32xf32> to vector<16xf32>
    %60 = vector.shape_cast %59 : vector<16xf32> to vector<16x1xf32>
    %cst_28 = arith.constant 3.200000e+01 : f32
    %61 = vector.broadcast %cst_28 : f32 to vector<16x1xf32>
    %62 = arith.divf %60, %61 : vector<16x1xf32>
    %63 = vector.broadcast %62 : vector<16x1xf32> to vector<16x32xf32>
    %64 = arith.subf %56, %63 : vector<16x32xf32>
    %65 = arith.mulf %64, %64 : vector<16x32xf32>
    %cst_29 = arith.constant dense<0.000000e+00> : vector<16xf32>
    %66 = vector.multi_reduction <add>, %65, %cst_29 [1] : vector<16x32xf32> to vector<16xf32>
    %67 = vector.shape_cast %66 : vector<16xf32> to vector<16x1xf32>
    %cst_30 = arith.constant 3.200000e+01 : f32
    %68 = vector.broadcast %cst_30 : f32 to vector<16x1xf32>
    %69 = arith.divf %67, %68 : vector<16x1xf32>
    %cst_31 = arith.constant 9.99999974E-6 : f32
    %70 = vector.broadcast %cst_31 : f32 to vector<16x1xf32>
    %71 = arith.addf %69, %70 : vector<16x1xf32>
    %72 = math.rsqrt %71 : vector<16x1xf32>
    %73 = vector.broadcast %72 : vector<16x1xf32> to vector<16x32xf32>
    %74 = arith.mulf %64, %73 : vector<16x32xf32>
    %75 = vector.broadcast %57 : vector<1x32xf32> to vector<16x32xf32>
    %76 = arith.mulf %74, %75 : vector<16x32xf32>
    %77 = vector.broadcast %58 : vector<1x32xf32> to vector<16x32xf32>
    %78 = arith.addf %76, %77 : vector<16x32xf32>
    %c0_32 = arith.constant 0 : index
    %c0_33 = arith.constant 0 : index
    %79 = vector.load %arg9[%c0_32, %c0_33] : memref<32x128xf32, #tpu.memory_space<vmem>>, vector<32x128xf32>
    %cst_34 = arith.constant dense<0.000000e+00> : vector<16x128xf32>
    %80 = tpu.matmul %78, %79, %cst_34 {dimension_numbers = #tpu.dot_dimension_numbers<[1], [0], [0], [1], [0, 0, 1, 1], [], []>} : vector<16x32xf32>, vector<32x128xf32>, vector<16x128xf32> -> vector<16x128xf32>
    %c0_35 = arith.constant 0 : index
    %c0_36 = arith.constant 0 : index
    %81 = vector.load %arg10[%c0_35, %c0_36] : memref<1x128xf32, #tpu.memory_space<vmem>>, vector<1x128xf32>
    %82 = vector.broadcast %81 : vector<1x128xf32> to vector<16x128xf32>
    %83 = arith.addf %80, %82 : vector<16x128xf32>
    %cst_37 = arith.constant 5.000000e-01 : f32
    %84 = vector.broadcast %cst_37 : f32 to vector<16x128xf32>
    %85 = arith.mulf %84, %83 : vector<16x128xf32>
    %cst_38 = arith.constant 0.707106769 : f32
    %86 = vector.broadcast %cst_38 : f32 to vector<16x128xf32>
    %87 = arith.mulf %83, %86 : vector<16x128xf32>
    %88 = math.erf %87 : vector<16x128xf32>
    %cst_39 = arith.constant 1.000000e+00 : f32
    %89 = vector.broadcast %cst_39 : f32 to vector<16x128xf32>
    %90 = arith.addf %89, %88 : vector<16x128xf32>
    %91 = arith.mulf %85, %90 : vector<16x128xf32>
    %c0_40 = arith.constant 0 : index
    %c0_41 = arith.constant 0 : index
    %92 = vector.load %arg11[%c0_40, %c0_41] : memref<128x32xf32, #tpu.memory_space<vmem>>, vector<128x32xf32>
    %cst_42 = arith.constant dense<0.000000e+00> : vector<16x32xf32>
    %93 = tpu.matmul %91, %92, %cst_42 {dimension_numbers = #tpu.dot_dimension_numbers<[1], [0], [0], [1], [0, 0, 1, 1], [], []>} : vector<16x128xf32>, vector<128x32xf32>, vector<16x32xf32> -> vector<16x32xf32>
    %c0_43 = arith.constant 0 : index
    %c0_44 = arith.constant 0 : index
    %94 = vector.load %arg12[%c0_43, %c0_44] : memref<1x32xf32, #tpu.memory_space<vmem>>, vector<1x32xf32>
    %95 = vector.broadcast %94 : vector<1x32xf32> to vector<16x32xf32>
    %96 = arith.addf %93, %95 : vector<16x32xf32>
    %97 = arith.addf %56, %96 : vector<16x32xf32>
    %c0_45 = arith.constant 0 : index
    %c0_46 = arith.constant 0 : index
    %98 = vector.load %arg13[%c0_45, %c0_46] : memref<16x32xf32, #tpu.memory_space<vmem>>, vector<16x32xf32>
    tpu.vector_store %arg13[%c0_45, %c0_46], %97 {strides = array<i32>} : memref<16x32xf32, #tpu.memory_space<vmem>>, vector<16x32xf32>,
    return
  }
}

</mosaic_0001>

<bundles_post_ra>
// kernel: block_forward.1
= control target key start
LH: loop header
LB: loop body
LE: loop exit
PB: predicated region body
PF: predicated region fallthrough
CT: control target
= control target key end

     0   :  { %vm49_vm0 = vcmask 261120   ;;  %s1461_s0 = inlined_call_operand.vmem [shape: f32[16,32], index: 0, kind: input, shape index: {}]   ;;  %s1462_s1 = inlined_call_operand.vmem [shape: f32[16,16], index: 1, kind: input, shape index: {}]   ;;  %s1463_s2 = inlined_call_operand.vmem [shape: f32[1,32], index: 2, kind: input, shape index: {}]   ;;  %s1464_s3 = inlined_call_operand.vmem [shape: f32[1,32], index: 3, kind: input, shape index: {}]   ;;  %s1465_s4 = inlined_call_operand.vmem [shape: f32[96,32], index: 4, kind: input, shape index: {}]   ;;  %s1466_s5 = inlined_call_operand.vmem [shape: f32[32,32], index: 5, kind: input, shape index: {}]   ;;  %s1467_s6 = inlined_call_operand.vmem [shape: f32[1,32], index: 6, kind: input, shape index: {}]   ;;  %s1468_s7 = inlined_call_operand.vmem [shape: f32[1,32], index: 7, kind: input, shape index: {}]   ;;  %s1469_s8 = inlined_call_operand.vmem [shape: f32[1,32], index: 8, kind: input, shape index: {}]   ;;  %s1470_s9 = inlined_call_operand.vmem [shape: f32[32,128], index: 9, kind: input, shape index: {}]   ;;  %s1471_s10 = inlined_call_operand.vmem [shape: f32[1,128], index: 10, kind: input, shape index: {}]   ;;  %s1472_s11 = inlined_call_operand.vmem [shape: f32[128,32], index: 11, kind: input, shape index: {}]   ;;  %s1473_s12 = inlined_call_operand.vmem [shape: f32[1,32], index: 12, kind: input, shape index: {}]   ;;  %s1474_s13 = inlined_call_operand.hbm [shape: f32[16,32], index: 13, kind: output, shape index: {}]  }
   0x1   :  { %v1192_v0 = vld [vmem:[%s1461_s0 + $0x8] sm:$0xff] }
   0x2   :  { %v53_v1 = vsel %vm49_vm0, %v1192_v0, 0.0 }
   0x3   :  { %54 = vadd.xlane.f32.xlu0 %v53_v1 }
   0x4   :  { %18 = vsyncpa [#allocation3], 0  ;;  %v1199_v2 = vld [vmem:[%s1461_s0] sm:$0xff]  ;;  %v1115_v4 = vmov 32.0   ;;  %v112_v50 = vld [vmem:[%s1465_s4 + $0x8] sm:$0xff]  ;;  %vm252_vm8 = vcmask 64512  }
   0x5   :  { %v50_v3 = vsel %vm49_vm0, %v1199_v2, 0.0  ;;  %1043 = vrcp.f32 %v1115_v4  ;;  %v1036_v35 = vld [vmem:[%s1463_s2] ss:$0 sm:$0xff]  ;;  %v113_v51 = vld [vmem:[%s1465_s4 + $0x10] sm:$0xff]  ;;  %v114_v52 = vld [vmem:[%s1465_s4 + $0x18] sm:$0xff]  ;;  %vm465_vm9 = vcmask 130048  }
   0x6   :  { %v1037_v39 = vld [vmem:[%s1464_s3] ss:$0 sm:$0xff]  ;;  %v116_v54 = vld [vmem:[%s1465_s4 + $0x28] sm:$0xff]  ;;  %v117_v56 = vld [vmem:[%s1465_s4 + $0x30] sm:$0xff]  ;;  %s1116_s21 = smov [#allocation2]   ;;  %s975_s25 = sshll.u32 %s1474_s13, 4  ;;  %s976_s25 = int_to_ptr.hbm [resolvable:$true] %s975_s25 }
   0x7   :  { %v111_v49 = vld [vmem:[%s1465_s4] sm:$0xff]  ;;  %v120_v58 = vld [vmem:[%s1465_s4 + $0x48] sm:$0xff]  ;;  %v118_v59 = vld [vmem:[%s1465_s4 + $0x38] sm:$0xff]  ;;  %s973_s22 = sshll.u32 %s1116_s21, 4  ;;  %s1118_s26 = smov 8   ;;  %s974_s22 = int_to_ptr.vmem [resolvable:$true] %s973_s22 }
   0x8   :  { %v115_v53 = vld [vmem:[%s1465_s4 + $0x20] sm:$0xff]  ;;  %v121_v1 = vld [vmem:[%s1465_s4 + $0x50] sm:$0xff]  ;;  %v122_v4 = vld [vmem:[%s1465_s4 + $0x58] sm:$0xff] }
   0x9   :  { %v119_v55 = vld [vmem:[%s1465_s4 + $0x40] sm:$0xff] }
   0xb   :  { %51 = vadd.xlane.f32.xlu0 %v50_v3  ;;  %v1044_v5 = vpop.eup %1043 }
   0xc   :  { %v57_v6 = vmul.f32 32.0, %v1044_v5  ;;  %vm61_vm1 = vweird.f32 %v1044_v5 }
   0xe   :  { %v58_v7 = vsub.f32 1.0, %v57_v6 }
  0x10   :  { %v59_v8 = vmul.f32 %v1044_v5, %v58_v7 }
  0x12   :  { %v60_v9 = vadd.f32 %v1044_v5, %v59_v8 }
  0x14   :  { %v1203_v10 = vsel %vm61_vm1, %v1044_v5, %v60_v9 }
  0x76   :  { %v55_v11 = vpop.xlane.xlu0 %54 }
  0x77   :  { %v64_v12 = vmul.f32 %v1203_v10, %v55_v11 }
  0x79   :  { %v66_v13 = vsub.f32 %v1192_v0, %v64_v12 }
  0x7b   :  { %v68_v14 = vmul.f32 %v66_v13, %v66_v13 }
  0x7d   :  { %v72_v15 = vsel %vm49_vm0, %v68_v14, 0.0 }
  0x7e   :  { %73 = vadd.xlane.f32.xlu1 %v72_v15  ;;  %v52_v16 = vpop.xlane.xlu0 %51 }
  0x7f   :  { %v63_v17 = vmul.f32 %v1203_v10, %v52_v16 }
  0x81   :  { %v65_v18 = vsub.f32 %v1199_v2, %v63_v17 }
  0x83   :  { %v67_v19 = vmul.f32 %v65_v18, %v65_v18 }
  0x85   :  { %v69_v20 = vsel %vm49_vm0, %v67_v19, 0.0 }
  0x86   :  { %70 = vadd.xlane.f32.xlu1 %v69_v20 }
  0xf1   :  { %v74_v21 = vpop.xlane.xlu1 %73 }
  0xf2   :  { %v76_v22 = vmul.f32 %v74_v21, %v1203_v10 }
  0xf4   :  { %v78_v23 = vadd.f32 1e-05, %v76_v22 }
  0xf6   :  { %1045 = vrsqrt.f32 %v78_v23  ;;  %vm95_vm3 = vweird.f32 %v78_v23 }
  0xf9   :  { %v71_v24 = vpop.xlane.xlu1 %70 }
  0xfa   :  { %v75_v25 = vmul.f32 %v71_v24, %v1203_v10 }
  0xfc   :  { %v1046_v26 = vpop.eup %1045  ;;  %v77_v27 = vadd.f32 1e-05, %v75_v25 }
  0xfd   :  { %v90_v28 = vmul.f32 %v1046_v26, %v78_v23  ;;  %vm96_vm2 = vweird.f32 %v1046_v26  ;;  %v219_v23 = vld [vmem:[%s1462_s1 + $0x8] sm:$0xff] }
  0xfe   :  { %1047 = vrsqrt.f32 %v77_v27  ;;  %vm97_vm4 = vmor %vm95_vm3, %vm96_vm2  ;;  %vm85_vm6 = vweird.f32 %v77_v27 }
  0xff   :  { %v91_v29 = vmul.f32 %v1046_v26, %v90_v28 }
 0x101   :  { %v92_v30 = vmul.f32 0.5, %v91_v29 }
 0x103   :  { %v93_v31 = vsub.f32 1.5, %v92_v30 }
 0x104   :  { %v1048_v32 = vpop.eup %1047 }
 0x105   :  { %v94_v33 = vmul.f32 %v1046_v26, %v93_v31  ;;  %v80_v34 = vmul.f32 %v1048_v32, %v77_v27  ;;  %vm86_vm5 = vweird.f32 %v1048_v32 }
 0x106   :  { %vm87_vm7 = vmor %vm85_vm6, %vm86_vm5 }
 0x107   :  { %v98_v36 = vsel %vm97_vm4, %v1046_v26, %v94_v33  ;;  %v81_v37 = vmul.f32 %v1048_v32, %v80_v34 }
 0x108   :  { %v100_v38 = vmul.f32 %v98_v36, %v66_v13 }
 0x109   :  { %v82_v40 = vmul.f32 0.5, %v81_v37 }
 0x10a   :  { %v105_v41 = vmul.f32 %v1036_v35, %v100_v38 }
 0x10b   :  { %v83_v42 = vsub.f32 1.5, %v82_v40 }
 0x10c   :  { %v110_v43 = vadd.f32 %v1037_v39, %v105_v41 }
 0x10d   :  { %v84_v44 = vmul.f32 %v1048_v32, %v83_v42 }
 0x10e   :  { %987 = vmatpush.xpose.msk.msra.mxu0 %vm49_vm0, %v110_v43  ;;  %1027 = vmatpush.xpose.msk.msra.mxu1 %vm49_vm0, %v110_v43 }
 0x10f   :  { %v88_v45 = vsel %vm87_vm7, %v1048_v32, %v84_v44  ;;  %1028 = vmatpush.xpose.msk.msra.mxu2 %vm49_vm0, %v110_v43 }
 0x110   :  { %v99_v46 = vmul.f32 %v88_v45, %v65_v18  ;;  %v218_v18 = vld [vmem:[%s1462_s1] sm:$0xff] }
 0x112   :  { %v104_v47 = vmul.f32 %v1036_v35, %v99_v46 }
 0x114   :  { %v109_v48 = vadd.f32 %v1037_v39, %v104_v47 }
 0x116   :  { %988 = vmatpush.xpose.msk.msra.mxu0 %vm49_vm0, %v109_v48  ;;  %1029 = vmatpush.xpose.msk.msra.mxu1 %vm49_vm0, %v109_v48 }
 0x117   :  { %1030 = vmatpush.xpose.msk.msra.mxu2 %vm49_vm0, %v109_v48 }
 0x119   :  { %989 = vmatmul.msk.f32.vlgmr.msra.gmra.mxu0 %vm49_vm0, %v111_v49  ;;  %997 = vmatmul.msk.f32.vlgmr.msra.gmra.mxu1 %vm49_vm0, %v119_v55 }
 0x11a   :  { %999 = vmatmul.msk.f32.vlgmr.msra.gmra.mxu2 %vm49_vm0, %v121_v1 }
 0x121   :  { %990 = vmatmul.msk.f32.gmra.mxu0 %vm49_vm0, %v112_v50  ;;  %998 = vmatmul.msk.f32.gmra.mxu1 %vm49_vm0, %v120_v58 }
 0x122   :  { %1000 = vmatmul.msk.f32.gmra.mxu2 %vm49_vm0, %v122_v4 }
 0x129   :  { %991 = vmatmul.msk.f32.gmra.mxu0 %vm49_vm0, %v113_v51 }
 0x131   :  { %992 = vmatmul.msk.f32.gmra.mxu0 %vm49_vm0, %v114_v52 }
 0x139   :  { %993 = vmatmul.msk.f32.gmra.mxu0 %vm49_vm0, %v115_v53 }
 0x141   :  { %994 = vmatmul.msk.f32.gmra.mxu0 %vm49_vm0, %v116_v54 }
 0x149   :  { %995 = vmatmul.msk.f32.gmra.mxu0 %vm49_vm0, %v117_v56 }
 0x151   :  { %996 = vmatmul.msk.f32.gmra.mxu0 %vm49_vm0, %v118_v59 }
 0x196   :  { %v182_v57 = vpop.f32.mrf.mxu0  ;;  %v1281_v16 = vpop.f32.mrf.mxu1 }
 0x197   :  { %220 = vxpose.xlu2.b32.start.end [1/1] (short) (narrow) %v182_v57, 16 }
 0x19d   :  { %v1288_v21 = vpop.f32.mrf.mxu2 }
 0x19e   :  { %v185_v60 = vpop.f32.mrf.mxu0  ;;  %v1283_v17 = vpop.f32.mrf.mxu1 }
 0x1a5   :  { %v1295_v27 = vpop.f32.mrf.mxu2 }
 0x1a6   :  { %v188_v61 = vpop.f32.mrf.mxu0 }
 0x1a7   :  { %282 = vxpose.xlu2.b32.start.end [1/1] (short) (narrow) %v185_v60, 16  ;;  %343 = vxpose.xlu0.b32.start.end [1/1] (short) (narrow) %v188_v61, 16 }
 0x1ae   :  { %v191_v62 = vpop.f32.mrf.mxu0 }
 0x1af   :  { %404 = vxpose.xlu1.b32.start.end [1/1] (short) (narrow) %v191_v62, 16 }
 0x1b6   :  { %v194_v63 = vpop.f32.mrf.mxu0 }
 0x1b7   :  { %274 = vmatpush.msrb.mxu1 %v194_v63 }
 0x1be   :  { %v197_v3 = vpop.f32.mrf.mxu0 }
 0x1bf   :  { %335 = vmatpush.msrb.mxu2 %v197_v3 }
 0x1c6   :  { %v200_v5 = vpop.f32.mrf.mxu0 }
 0x1c7   :  { %396 = vmatpush.msra.mxu3 %v200_v5 }
 0x1ce   :  { %v203_v6 = vpop.f32.mrf.mxu0 }
 0x1cf   :  { %457 = vmatpush.msra.mxu1 %v203_v6 }
 0x230   :  { %v236_v7 = vpop.trf.xlu2 }
 0x231   :  { %1001 = vmatmul.msk.f32.vlgmr.msrb.gmra.mxu1 %vm252_vm8, %v236_v7 }
 0x238   :  { %v237_v8 = vpop.trf.xlu2 }
 0x239   :  { %1002 = vmatmul.msk.f32.gmra.mxu1 %vm252_vm8, %v237_v8 }
 0x240   :  { %v298_v9 = vpop.trf.xlu2 }
 0x241   :  { %1003 = vmatmul.msk.f32.vlgmr.msrb.gmra.mxu2 %vm252_vm8, %v298_v9 }
 0x248   :  { %v299_v11 = vpop.trf.xlu2 }
 0x249   :  { %1004 = vmatmul.msk.f32.gmra.mxu2 %vm252_vm8, %v299_v11 }
 0x24b   :  { %v359_v12 = vpop.trf.xlu0 }
 0x24c   :  { %1005 = vmatmul.msk.f32.vlgmr.msra.gmra.mxu3 %vm252_vm8, %v359_v12 }
 0x253   :  { %v360_v13 = vpop.trf.xlu0  ;;  %v420_v14 = vpop.trf.xlu1 }
 0x254   :  { %1006 = vmatmul.msk.f32.gmra.mxu3 %vm252_vm8, %v360_v13  ;;  %1007 = vmatmul.msk.f32.vlgmr.msra.gmra.mxu1 %vm252_vm8, %v420_v14 }
 0x25b   :  { %v421_v15 = vpop.trf.xlu1 }
 0x25c   :  { %1008 = vmatmul.msk.f32.gmra.mxu1 %vm252_vm8, %v421_v15 }
 0x2ae   :  { %v276_v19 = vpop.f32.mrf.mxu1 }
 0x2af   :  { %v277_v20 = vadd.f32 %v276_v19, %v218_v18 }
 0x2b1   :  { %v466_v22 = vsel %vm465_vm9, %v277_v20, -inf }
 0x2b2   :  { %467 = vmax.xlane.f32.xlu1 %v466_v22 }
 0x2b6   :  { %v279_v24 = vpop.f32.mrf.mxu1 }
 0x2b7   :  { %v280_v25 = vadd.f32 %v279_v24, %v219_v23 }
 0x2b9   :  { %v469_v26 = vsel %vm465_vm9, %v280_v25, -inf }
 0x2ba   :  { %470 = vmax.xlane.f32.xlu2 %v469_v26 }
 0x2c4   :  { %v337_v28 = vpop.f32.mrf.mxu2 }
 0x2c5   :  { %v338_v29 = vadd.f32 %v337_v28, %v218_v18 }
 0x2c7   :  { %v472_v30 = vsel %vm465_vm9, %v338_v29, -inf }
 0x2c8   :  { %473 = vmax.xlane.f32.xlu2 %v472_v30 }
 0x2cc   :  { %v340_v31 = vpop.f32.mrf.mxu2 }
 0x2cd   :  { %v341_v32 = vadd.f32 %v340_v31, %v219_v23 }
 0x2cf   :  { %v398_v33 = vpop.f32.mrf.mxu3  ;;  %v475_v34 = vsel %vm465_vm9, %v341_v32, -inf }
 0x2d0   :  { %v399_v35 = vadd.f32 %v398_v33, %v218_v18  ;;  %476 = vmax.xlane.f32.xlu0 %v475_v34 }
 0x2d1   :  { %v459_v36 = vpop.f32.mrf.mxu1 }
 0x2d2   :  { %v478_v37 = vsel %vm465_vm9, %v399_v35, -inf  ;;  %v460_v44 = vadd.f32 %v459_v36, %v218_v18 }
 0x2d3   :  { %479 = vmax.xlane.f32.xlu2 %v478_v37 }
 0x2d4   :  { %v484_v45 = vsel %vm465_vm9, %v460_v44, -inf }
 0x2d7   :  { %v401_v38 = vpop.f32.mrf.mxu3 }
 0x2d8   :  { %v402_v39 = vadd.f32 %v401_v38, %v219_v23 }
 0x2d9   :  { %v462_v40 = vpop.f32.mrf.mxu1 }
 0x2da   :  { %v481_v41 = vsel %vm465_vm9, %v402_v39, -inf  ;;  %v463_v42 = vadd.f32 %v462_v40, %v219_v23 }
 0x2db   :  { %482 = vmax.xlane.f32.xlu2 %v481_v41 }
 0x2dc   :  { %v487_v43 = vsel %vm465_vm9, %v463_v42, -inf }
 0x2e3   :  { %488 = vmax.xlane.f32.xlu2 %v487_v43 }
 0x2eb   :  { %485 = vmax.xlane.f32.xlu2 %v484_v45 }
 0x325   :  { %v468_v46 = vpop.xlane.xlu1 %467 }
 0x326   :  { %v490_v47 = vsub.f32 %v277_v20, %v468_v46 }
 0x328   :  { %v498_v48 = vmul.f32 1.442695, %v490_v47 }
 0x32a   :  { %1049 = vpow2.f32 %v498_v48 }
 0x32d   :  { %v471_v49 = vpop.xlane.xlu2 %470 }
 0x32e   :  { %v491_v50 = vsub.f32 %v280_v25, %v471_v49 }
 0x330   :  { %v1050_v51 = vpop.eup %1049  ;;  %v500_v52 = vmul.f32 1.442695, %v491_v50 }
 0x331   :  { %v514_v53 = vsel %vm465_vm9, %v1050_v51, 0.0 }
 0x332   :  { %1051 = vpow2.f32 %v500_v52  ;;  %515 = vadd.xlane.f32.xlu2 %v514_v53  ;;  %v705_v52 = vld [vmem:[%s1466_s5 + $0x18] sm:$0xff]  ;;  %v704_v53 = vld [vmem:[%s1466_s5 + $0x10] sm:$0xff] }
 0x333   :  { %728 = vmatpush.msrb.mxu1 %v705_v52  ;;  %v934_v52 = vld [vmem:[%s1472_s11 + $0x60] sm:$0xff] }
 0x335   :  { %729 = vmatpush.msrb.mxu1 %v704_v53  ;;  %v933_v53 = vld [vmem:[%s1472_s11 + $0x58] sm:$0xff] }
 0x338   :  { %v1052_v54 = vpop.eup %1051 }
 0x339   :  { %v517_v55 = vsel %vm465_vm9, %v1052_v54, 0.0 }
 0x33a   :  { %518 = vadd.xlane.f32.xlu0 %v517_v55 }
 0x33b   :  { %v474_v56 = vpop.xlane.xlu2 %473 }
 0x33c   :  { %v492_v57 = vsub.f32 %v338_v29, %v474_v56 }
 0x33e   :  { %v502_v58 = vmul.f32 1.442695, %v492_v57 }
 0x340   :  { %1053 = vpow2.f32 %v502_v58 }
 0x343   :  { %v477_v59 = vpop.xlane.xlu0 %476 }
 0x344   :  { %v493_v60 = vsub.f32 %v341_v32, %v477_v59  ;;  %v1038_v59 = vld [vmem:[%s1467_s6] ss:$0 sm:$0xff] }
 0x346   :  { %v1054_v61 = vpop.eup %1053  ;;  %v504_v62 = vmul.f32 1.442695, %v493_v60  ;;  %v480_v63 = vpop.xlane.xlu2 %479 }
 0x347   :  { %v494_v1 = vsub.f32 %v399_v35, %v480_v63  ;;  %v520_v3 = vsel %vm465_vm9, %v1054_v61, 0.0 }
 0x348   :  { %1055 = vpow2.f32 %v504_v62  ;;  %521 = vadd.xlane.f32.xlu0 %v520_v3 }
 0x349   :  { %v506_v4 = vmul.f32 1.442695, %v494_v1 }
 0x34b   :  { %1057 = vpow2.f32 %v506_v4 }
 0x34e   :  { %v1056_v5 = vpop.eup %1055  ;;  %v483_v6 = vpop.xlane.xlu2 %482 }
 0x34f   :  { %v495_v7 = vsub.f32 %v402_v39, %v483_v6  ;;  %v523_v8 = vsel %vm465_vm9, %v1056_v5, 0.0 }
 0x350   :  { %524 = vadd.xlane.f32.xlu1 %v523_v8 }
 0x351   :  { %v1058_v9 = vpop.eup %1057  ;;  %v508_v11 = vmul.f32 1.442695, %v495_v7 }
 0x352   :  { %v526_v12 = vsel %vm465_vm9, %v1058_v9, 0.0 }
 0x353   :  { %1059 = vpow2.f32 %v508_v11  ;;  %527 = vadd.xlane.f32.xlu0 %v526_v12 }
 0x356   :  { %v489_v13 = vpop.xlane.xlu2 %488 }
 0x357   :  { %v497_v14 = vsub.f32 %v463_v42, %v489_v13 }
 0x359   :  { %v1060_v15 = vpop.eup %1059  ;;  %v512_v18 = vmul.f32 1.442695, %v497_v14 }
 0x35a   :  { %v529_v19 = vsel %vm465_vm9, %v1060_v15, 0.0 }
 0x35b   :  { %1061 = vpow2.f32 %v512_v18  ;;  %530 = vadd.xlane.f32.xlu1 %v529_v19  ;;  %v799_v18 = vld [vmem:[%s1470_s9 + $0x10] sm:$0xff]  ;;  %v798_v19 = vld [vmem:[%s1470_s9 + $0x8] sm:$0xff] }
 0x35e   :  { %v486_v20 = vpop.xlane.xlu2 %485 }
 0x35f   :  { %v496_v22 = vsub.f32 %v460_v44, %v486_v20  ;;  %v797_v20 = vld [vmem:[%s1470_s9] sm:$0xff] }
 0x361   :  { %v1062_v23 = vpop.eup %1061  ;;  %v510_v24 = vmul.f32 1.442695, %v496_v22 }
 0x362   :  { %v535_v25 = vsel %vm465_vm9, %v1062_v23, 0.0 }
 0x363   :  { %1063 = vpow2.f32 %v510_v24  ;;  %536 = vadd.xlane.f32.xlu2 %v535_v25 }
 0x369   :  { %v1064_v26 = vpop.eup %1063 }
 0x36a   :  { %v532_v28 = vsel %vm465_vm9, %v1064_v26, 0.0 }
 0x36b   :  { %533 = vadd.xlane.f32.xlu1 %v532_v28 }
 0x3a5   :  { %v516_v29 = vpop.xlane.xlu2 %515 }
 0x3ad   :  { %v519_v30 = vpop.xlane.xlu0 %518 }
 0x3ae   :  { %1065 = vrcp.f32 %v519_v30 }
 0x3af   :  { %1067 = vrcp.f32 %v516_v29 }
 0x3b4   :  { %v1066_v31 = vpop.eup %1065 }
 0x3b5   :  { %v547_v32 = vmul.f32 %v1066_v31, %v1052_v54  ;;  %v1068_v33 = vpop.eup %1067 }
 0x3b6   :  { %v546_v34 = vmul.f32 %v1068_v33, %v1050_v51 }
 0x3b7   :  { %1009 = vmatpush.xpose.msk.msra.mxu2 %vm465_vm9, %v547_v32 }
 0x3bb   :  { %1010 = vmatpush.xpose.msk.msra.mxu2 %vm465_vm9, %v546_v34  ;;  %v522_v35 = vpop.xlane.xlu0 %521 }
 0x3be   :  { %1011 = vmatmul.msk.f32.vlgmr.msra.gmra.mxu2 %vm465_vm9, %v1281_v16 }
 0x3c3   :  { %v525_v36 = vpop.xlane.xlu1 %524 }
 0x3c4   :  { %1069 = vrcp.f32 %v525_v36 }
 0x3c5   :  { %1071 = vrcp.f32 %v522_v35 }
 0x3c6   :  { %v528_v40 = vpop.xlane.xlu0 %527 }
 0x3ca   :  { %v1070_v37 = vpop.eup %1069 }
 0x3cb   :  { %v549_v38 = vmul.f32 %v1070_v37, %v1056_v5  ;;  %v1072_v39 = vpop.eup %1071  ;;  %v1039_v37 = vld [vmem:[%s1468_s7] ss:$0 sm:$0xff] }
 0x3cc   :  { %v548_v42 = vmul.f32 %v1072_v39, %v1054_v61 }
 0x3cd   :  { %1012 = vmatpush.xpose.msk.msrb.mxu3 %vm465_vm9, %v549_v38 }
 0x3ce   :  { %v531_v41 = vpop.xlane.xlu1 %530 }
 0x3cf   :  { %1073 = vrcp.f32 %v531_v41 }
 0x3d0   :  { %1075 = vrcp.f32 %v528_v40  ;;  %v1040_v40 = vld [vmem:[%s1469_s8] ss:$0 sm:$0xff] }
 0x3d1   :  { %1013 = vmatpush.xpose.msk.msrb.mxu3 %vm465_vm9, %v548_v42 }
 0x3d4   :  { %1014 = vmatmul.msk.f32.vlgmr.msrb.gmra.mxu3 %vm465_vm9, %v1283_v17 }
 0x3d5   :  { %v1074_v16 = vpop.eup %1073 }
 0x3d6   :  { %v551_v43 = vmul.f32 %v1074_v16, %v1060_v15  ;;  %v537_v44 = vpop.xlane.xlu2 %536  ;;  %v1076_v45 = vpop.eup %1075  ;;  %v800_v15 = vld [vmem:[%s1470_s9 + $0x18] sm:$0xff] }
 0x3d7   :  { %1077 = vrcp.f32 %v537_v44  ;;  %v550_v46 = vmul.f32 %v1076_v45, %v1058_v9 }
 0x3d8   :  { %1015 = vmatpush.xpose.msk.msrb.mxu2 %vm465_vm9, %v551_v43 }
 0x3dc   :  { %1016 = vmatpush.xpose.msk.msrb.mxu2 %vm465_vm9, %v550_v46 }
 0x3dd   :  { %v1078_v47 = vpop.eup %1077 }
 0x3de   :  { %v553_v48 = vmul.f32 %v1078_v47, %v1062_v23  ;;  %v534_v49 = vpop.xlane.xlu1 %533 }
 0x3df   :  { %1079 = vrcp.f32 %v534_v49  ;;  %1017 = vmatmul.msk.f32.vlgmr.msrb.gmra.mxu2 %vm465_vm9, %v1288_v21  ;;  %v703_v21 = vld [vmem:[%s1466_s5 + $0x8] sm:$0xff]  ;;  %v937_v49 = vld [vmem:[%s1472_s11 + $0x78] sm:$0xff] }
 0x3e0   :  { %1018 = vmatpush.xpose.msk.msra.mxu3 %vm465_vm9, %v553_v48  ;;  %730 = vmatpush.msrb.mxu1 %v703_v21 }
 0x3e1   :  { %823 = vmatpush.msra.mxu2 %v800_v15 }
 0x3e3   :  { %824 = vmatpush.msra.mxu2 %v799_v18 }
 0x3e5   :  { %v1080_v17 = vpop.eup %1079  ;;  %825 = vmatpush.msra.mxu2 %v798_v19 }
 0x3e6   :  { %v552_v50 = vmul.f32 %v1080_v17, %v1064_v26  ;;  %v936_v17 = vld [vmem:[%s1472_s11 + $0x70] sm:$0xff] }
 0x3e7   :  { %826 = vmatpush.msra.mxu2 %v797_v20  ;;  %v924_v20 = vld [vmem:[%s1472_s11 + $0x10] sm:$0xff] }
 0x3e8   :  { %1019 = vmatpush.xpose.msk.msra.mxu3 %vm465_vm9, %v552_v50  ;;  %v935_v50 = vld [vmem:[%s1472_s11 + $0x68] sm:$0xff] }
 0x3eb   :  { %1020 = vmatmul.msk.f32.vlgmr.msra.gmra.mxu3 %vm465_vm9, %v1295_v27  ;;  %v702_v27 = vld [vmem:[%s1466_s5] sm:$0xff] }
 0x3ec   :  { %731 = vmatpush.msrb.mxu1 %v702_v27  ;;  %942 = vmatpush.msrb.mxu3 %v937_v49 }
 0x3ee   :  { %943 = vmatpush.msrb.mxu3 %v936_v17 }
 0x3f0   :  { %944 = vmatpush.msrb.mxu3 %v935_v50 }
 0x3f2   :  { %945 = vmatpush.msrb.mxu3 %v934_v52 }
 0x3f4   :  { %946 = vmatpush.msrb.mxu3 %v933_v53 }
 0x441   :  { %v580_v51 = vpop.f32.mrf.mxu2 }
 0x442   :  { %670 = vxpose.xlu2.b32.start [1/4] (short) (narrow) %v580_v51, 16  ;;  %v1041_v51 = vld [vmem:[%s1471_s10] ss:$0 sm:$0xff] }
 0x457   :  { %v609_v54 = vpop.f32.mrf.mxu3 }
 0x458   :  { %671 = vxpose.xlu2.b32.cont [2/4] (short) (narrow) %v609_v54, 16  ;;  %v932_v54 = vld [vmem:[%s1472_s11 + $0x50] sm:$0xff] }
 0x459   :  { %947 = vmatpush.msrb.mxu3 %v932_v54 }
 0x462   :  { %v638_v55 = vpop.f32.mrf.mxu2 }
 0x463   :  { %672 = vxpose.xlu2.b32.cont [3/4] (short) (narrow) %v638_v55, 16 }
 0x46e   :  { %v667_v56 = vpop.f32.mrf.mxu3 }
 0x46f   :  { %673 = vxpose.xlu2.b32.end [4/4] (short) (narrow) %v667_v56, 16  ;;  %v931_v56 = vld [vmem:[%s1472_s11 + $0x48] sm:$0xff] }
 0x470   :  { %948 = vmatpush.msrb.mxu3 %v931_v56 }
 0x4f0   :  { %v686_v57 = vpop.trf.xlu2 }
 0x4f1   :  { %1021 = vmatmul.msk.f32.vlgmr.msrb.gmra.mxu1 %vm49_vm0, %v686_v57 }
 0x4f8   :  { %v687_v58 = vpop.trf.xlu2 }
 0x4f9   :  { %1022 = vmatmul.msk.f32.gmra.mxu1 %vm49_vm0, %v687_v58  ;;  %v930_v58 = vld [vmem:[%s1472_s11 + $0x40] sm:$0xff] }
 0x4fa   :  { %949 = vmatpush.msrb.mxu3 %v930_v58 }
 0x56e   :  { %v733_v60 = vpop.f32.mrf.mxu1 }
 0x56f   :  { %v734_v61 = vadd.f32 %v1038_v59, %v733_v60  ;;  %v929_v60 = vld [vmem:[%s1472_s11 + $0x38] sm:$0xff] }
 0x570   :  { %950 = vmatpush.msrb.mxu3 %v929_v60 }
 0x571   :  { %v1345_v62 = vadd.f32 %v734_v61, %v1199_v2 }
 0x573   :  { %v743_v63 = vsel %vm49_vm0, %v1345_v62, 0.0 }
 0x574   :  { %744 = vadd.xlane.f32.xlu0 %v743_v63 }
 0x576   :  { %v736_v1 = vpop.f32.mrf.mxu1 }
 0x577   :  { %v737_v3 = vadd.f32 %v1038_v59, %v736_v1 }
 0x579   :  { %v1350_v4 = vadd.f32 %v737_v3, %v1192_v0 }
 0x57b   :  { %v746_v5 = vsel %vm49_vm0, %v1350_v4, 0.0 }
 0x57c   :  { %747 = vadd.xlane.f32.xlu1 %v746_v5  ;;  %v928_v5 = vld [vmem:[%s1472_s11 + $0x30] sm:$0xff] }
 0x57d   :  { %951 = vmatpush.msrb.mxu3 %v928_v5 }
 0x5e7   :  { %v745_v6 = vpop.xlane.xlu0 %744 }
 0x5e8   :  { %v749_v7 = vmul.f32 %v745_v6, %v1203_v10 }
 0x5ea   :  { %v751_v8 = vsub.f32 %v1345_v62, %v749_v7 }
 0x5ec   :  { %v753_v2 = vmul.f32 %v751_v8, %v751_v8 }
 0x5ee   :  { %v755_v9 = vsel %vm49_vm0, %v753_v2, 0.0 }
 0x5ef   :  { %756 = vadd.xlane.f32.xlu0 %v755_v9  ;;  %v748_v11 = vpop.xlane.xlu1 %747 }
 0x5f0   :  { %v750_v12 = vmul.f32 %v748_v11, %v1203_v10 }
 0x5f2   :  { %v752_v13 = vsub.f32 %v1350_v4, %v750_v12  ;;  %v926_v12 = vld [vmem:[%s1472_s11 + $0x20] sm:$0xff] }
 0x5f4   :  { %v754_v0 = vmul.f32 %v752_v13, %v752_v13 }
 0x5f6   :  { %v758_v14 = vsel %vm49_vm0, %v754_v0, 0.0 }
 0x5f7   :  { %759 = vadd.xlane.f32.xlu1 %v758_v14  ;;  %v925_v14 = vld [vmem:[%s1472_s11 + $0x18] sm:$0xff] }
 0x662   :  { %v757_v22 = vpop.xlane.xlu0 %756 }
 0x663   :  { %v761_v23 = vmul.f32 %v757_v22, %v1203_v10 }
 0x665   :  { %v763_v24 = vadd.f32 1e-05, %v761_v23 }
 0x667   :  { %1081 = vrsqrt.f32 %v763_v24  ;;  %vm771_vm11 = vweird.f32 %v763_v24 }
 0x66a   :  { %v760_v25 = vpop.xlane.xlu1 %759 }
 0x66b   :  { %v762_v26 = vmul.f32 %v760_v25, %v1203_v10  ;;  %v923_v25 = vld [vmem:[%s1472_s11 + $0x8] sm:$0xff] }
 0x66d   :  { %v1082_v28 = vpop.eup %1081  ;;  %v764_v29 = vadd.f32 1e-05, %v762_v26 }
 0x66e   :  { %v766_v30 = vmul.f32 %v1082_v28, %v763_v24  ;;  %vm772_vm10 = vweird.f32 %v1082_v28 }
 0x66f   :  { %1083 = vrsqrt.f32 %v764_v29  ;;  %vm773_vm12 = vmor %vm771_vm11, %vm772_vm10  ;;  %vm781_vm14 = vweird.f32 %v764_v29 }
 0x670   :  { %v767_v31 = vmul.f32 %v1082_v28, %v766_v30 }
 0x672   :  { %v768_v32 = vmul.f32 0.5, %v767_v31 }
 0x674   :  { %v769_v33 = vsub.f32 1.5, %v768_v32 }
 0x675   :  { %v1084_v34 = vpop.eup %1083 }
 0x676   :  { %v770_v35 = vmul.f32 %v1082_v28, %v769_v33  ;;  %v776_v36 = vmul.f32 %v1084_v34, %v764_v29  ;;  %vm782_vm13 = vweird.f32 %v1084_v34  ;;  %v922_v29 = vld [vmem:[%s1472_s11] sm:$0xff] }
 0x677   :  { %vm783_vm15 = vmor %vm781_vm14, %vm782_vm13 }
 0x678   :  { %v774_v38 = vsel %vm773_vm12, %v1082_v28, %v770_v35  ;;  %v777_v39 = vmul.f32 %v1084_v34, %v776_v36 }
 0x679   :  { %v785_v10 = vmul.f32 %v774_v38, %v751_v8  ;;  %v927_v8 = vld [vmem:[%s1472_s11 + $0x28] sm:$0xff] }
 0x67a   :  { %v778_v41 = vmul.f32 0.5, %v777_v39  ;;  %952 = vmatpush.msrb.mxu3 %v927_v8 }
 0x67b   :  { %v790_v42 = vmul.f32 %v1039_v37, %v785_v10 }
 0x67c   :  { %v779_v16 = vsub.f32 1.5, %v778_v41  ;;  %953 = vmatpush.msrb.mxu3 %v926_v12 }
 0x67d   :  { %v795_v43 = vadd.f32 %v1040_v40, %v790_v42 }
 0x67e   :  { %v780_v44 = vmul.f32 %v1084_v34, %v779_v16  ;;  %954 = vmatpush.msrb.mxu3 %v925_v14 }
 0x67f   :  { %1023 = vmatmul.msk.f32.vlgmr.msra.gmra.mxu2 %vm49_vm0, %v795_v43 }
 0x680   :  { %v784_v45 = vsel %vm783_vm15, %v1084_v34, %v780_v44  ;;  %955 = vmatpush.msrb.mxu3 %v924_v20 }
 0x681   :  { %v786_v46 = vmul.f32 %v784_v45, %v752_v13 }
 0x682   :  { %956 = vmatpush.msrb.mxu3 %v923_v25 }
 0x683   :  { %v791_v47 = vmul.f32 %v1039_v37, %v786_v46 }
 0x684   :  { %957 = vmatpush.msrb.mxu3 %v922_v29 }
 0x685   :  { %v796_v48 = vadd.f32 %v1040_v40, %v791_v47 }
 0x687   :  { %1024 = vmatmul.msk.f32.gmra.mxu2 %vm49_vm0, %v796_v48 }
 0x702   :  { %v828_v21 = vpop.f32.mrf.mxu2 }
 0x703   :  { %v1400_v27 = vadd.f32 %v1041_v51, %v828_v21 }
 0x705   :  { %v1406_v55 = vmul.f32 0.70710677, %v1400_v27 }
 0x707   :  { %v838_v57 = vmul.f32 %v1406_v55, %v1406_v55 }
 0x709   :  { %v839_v59 = vmin.f32 %v838_v57, 16.0 }
 0x70a   :  { %v831_v61 = vpop.f32.mrf.mxu2 }
 0x70b   :  { %v840_v63 = vmul.f32 2.1237322e-06, %v839_v59  ;;  %v851_v1 = vmul.f32 3.8918573e-05, %v839_v59  ;;  %v1419_v3 = vadd.f32 %v1041_v51, %v831_v61 }
 0x70d   :  { %v841_v6 = vadd.f32 0.00028619796, %v840_v63  ;;  %v852_v7 = vadd.f32 0.001143296, %v851_v1  ;;  %v1428_v2 = vmul.f32 0.70710677, %v1419_v3 }
 0x70e   :  { %v835_v25 = vmul.f32 0.5, %v1419_v3 }
 0x70f   :  { %v842_v9 = vmul.f32 %v841_v6, %v839_v59  ;;  %v853_v11 = vmul.f32 %v852_v7, %v839_v59  ;;  %v878_v13 = vmul.f32 %v1428_v2, %v1428_v2 }
 0x711   :  { %v854_v0 = vadd.f32 0.014752088, %v853_v11  ;;  %v843_v15 = vadd.f32 0.0036580483, %v842_v9  ;;  %v879_v18 = vmin.f32 %v878_v13, 16.0 }
 0x713   :  { %v855_v19 = vmul.f32 %v854_v0, %v839_v59  ;;  %v880_v22 = vmul.f32 2.1237322e-06, %v879_v18  ;;  %v891_v23 = vmul.f32 3.8918573e-05, %v879_v18  ;;  %v844_v26 = vmul.f32 %v843_v15, %v839_v59 }
 0x714   :  { %v834_v0 = vmul.f32 0.5, %v1400_v27  ;;  %v1042_v27 = vld [vmem:[%s1473_s12] ss:$0 sm:$0xff]  ;;  %s1117_s12 = smov 128  }
 0x715   :  { %v856_v24 = vadd.f32 0.112945676, %v855_v19  ;;  %v881_v28 = vadd.f32 0.00028619796, %v880_v22  ;;  %v892_v30 = vadd.f32 0.001143296, %v891_v23 }
 0x716   :  { %v845_v35 = vadd.f32 0.05243302, %v844_v26 }
 0x717   :  { %v857_v31 = vmul.f32 %v856_v24, %v839_v59  ;;  %v882_v32 = vmul.f32 %v881_v28, %v879_v18  ;;  %v893_v33 = vmul.f32 %v892_v30, %v879_v18 }
 0x718   :  { %v846_v40 = vmul.f32 %v845_v35, %v839_v59 }
 0x719   :  { %v858_v34 = vadd.f32 0.4994258, %v857_v31  ;;  %v894_v36 = vadd.f32 0.014752088, %v893_v33  ;;  %v883_v38 = vadd.f32 0.0036580483, %v882_v32 }
 0x71a   :  { %v847_v43 = vadd.f32 0.18741608, %v846_v40 }
 0x71b   :  { %v859_v37 = vmul.f32 %v858_v34, %v839_v59  ;;  %v895_v39 = vmul.f32 %v894_v36, %v879_v18  ;;  %v884_v42 = vmul.f32 %v883_v38, %v879_v18 }
 0x71c   :  { %v848_v48 = vmul.f32 %v847_v43, %v839_v59 }
 0x71d   :  { %v860_v10 = vadd.f32 1.0, %v859_v37  ;;  %v896_v41 = vadd.f32 0.112945676, %v895_v39  ;;  %v885_v45 = vadd.f32 0.05243302, %v884_v42 }
 0x71e   :  { %v849_v53 = vadd.f32 1.1283791, %v848_v48 }
 0x71f   :  { %1085 = vrcp.f32 %v860_v10  ;;  %v897_v16 = vmul.f32 %v896_v41, %v879_v18  ;;  %v886_v50 = vmul.f32 %v885_v45, %v879_v18  ;;  %v872_v52 = vand.u32 2147483648, %v860_v10 }
 0x720   :  { %v870_v54 = vand.u32 2147483647, %v860_v10  ;;  %vm866_vm2 = vweird.f32 %v860_v10  ;;  %v850_v61 = vmul.f32 %v849_v53, %v1406_v55 }
 0x721   :  { %v898_v44 = vadd.f32 0.4994258, %v897_v16  ;;  %v887_v56 = vadd.f32 0.18741608, %v886_v50  ;;  %v873_v58 = vor.u32 1.1754944e-38, %v872_v52 }
 0x722   :  { %vm871_vm4 = vcmp.eq.f32.partialorder %v870_v54, 8.507059e+37 }
 0x723   :  { %v899_v46 = vmul.f32 %v898_v44, %v879_v18  ;;  %v888_v1 = vmul.f32 %v887_v56, %v879_v18 }
 0x725   :  { %v1086_v47 = vpop.eup %1085  ;;  %v900_v17 = vadd.f32 1.0, %v899_v46  ;;  %v889_v11 = vadd.f32 1.1283791, %v888_v1 }
 0x726   :  { %v862_v49 = vmul.f32 %v1086_v47, %v860_v10  ;;  %vm867_vm1 = vweird.f32 %v1086_v47 }
 0x727   :  { %1087 = vrcp.f32 %v900_v17  ;;  %vm868_vm3 = vmor %vm866_vm2, %vm867_vm1  ;;  %v912_v9 = vand.u32 2147483648, %v900_v17  ;;  %v910_v13 = vand.u32 2147483647, %v900_v17  ;;  %vm906_vm6 = vweird.f32 %v900_v17 }
 0x728   :  { %v863_v51 = vsub.f32 1.0, %v862_v49  ;;  %v890_v20 = vmul.f32 %v889_v11, %v1428_v2 }
 0x729   :  { %v913_v55 = vor.u32 1.1754944e-38, %v912_v9  ;;  %vm911_vm8 = vcmp.eq.f32.partialorder %v910_v13, 8.507059e+37 }
 0x72a   :  { %v864_v21 = vmul.f32 %v1086_v47, %v863_v51 }
 0x72c   :  { %v865_v57 = vadd.f32 %v1086_v47, %v864_v21 }
 0x72d   :  { %v1088_v60 = vpop.eup %1087 }
 0x72e   :  { %v869_v63 = vsel %vm868_vm3, %v1086_v47, %v865_v57  ;;  %v902_v5 = vmul.f32 %v1088_v60, %v900_v17  ;;  %vm907_vm5 = vweird.f32 %v1088_v60 }
 0x72f   :  { %v874_v59 = vsel %vm871_vm4, %v873_v58, %v869_v63  ;;  %vm908_vm7 = vmor %vm906_vm6, %vm907_vm5 }
 0x730   :  { %v875_v6 = vmul.f32 %v874_v59, %v850_v61  ;;  %v903_v7 = vsub.f32 1.0, %v902_v5 }
 0x732   :  { %v1025_v8 = vclamps-f32 %v875_v6, 1.0  ;;  %v904_v12 = vmul.f32 %v1088_v60, %v903_v7 }
 0x734   :  { %v918_v14 = vadd.f32 1.0, %v1025_v8  ;;  %v905_v15 = vadd.f32 %v1088_v60, %v904_v12 }
 0x736   :  { %v920_v19 = vmul.f32 %v918_v14, %v834_v0  ;;  %v909_v18 = vsel %vm908_vm7, %v1088_v60, %v905_v15 }
 0x737   :  { %v914_v22 = vsel %vm911_vm8, %v913_v55, %v909_v18 }
 0x738   :  { %958 = vmatmul.f32.vlgmr.msrb.gmra.mxu3 %v920_v19  ;;  %v915_v23 = vmul.f32 %v914_v22, %v890_v20 }
 0x73a   :  { %v1026_v24 = vclamps-f32 %v915_v23, 1.0 }
 0x73c   :  { %v919_v26 = vadd.f32 1.0, %v1026_v24 }
 0x73e   :  { %v921_v28 = vmul.f32 %v919_v26, %v835_v25 }
 0x740   :  { %961 = vmatmul.f32.gmra.mxu3 %v921_v28 }
 0x7bb   :  { %v959_v29 = vpop.f32.mrf.mxu3 }
 0x7bc   :  { %v960_v30 = vadd.f32 %v1042_v27, %v959_v29 }
 0x7be   :  { %v965_v31 = vadd.f32 %v960_v30, %v1345_v62 }
 0x7c0   :  { %967 = vst.msk [vmem:[#allocation2] sm:$0xff] %vm49_vm0, %v965_v31 }
 0x7c3   :  { %v962_v3 = vpop.f32.mrf.mxu3 }
 0x7c4   :  { %v963_v2 = vadd.f32 %v1042_v27, %v962_v3 }
 0x7c6   :  { %v966_v32 = vadd.f32 %v963_v2, %v1350_v4 }
 0x7c8   :  { %968 = vst.msk [vmem:[#allocation2 + $0x8] sm:$0xff] %vm49_vm0, %v966_v32 }
 0x7c9   :  { %981 = dma.vmem_to_hbm [thread:$0]  %s974_s22, 256, %s976_s25, [#allocation3], %s1117_s12, %s1117_s12, %s1118_s26  }
 0x7ca   :  { %1113 = dma.done.wait [#allocation3], 256  }
 0x7cb   :  { %1114 = vsyncadd [#allocation3], 4294967040 }
 0x7cc   :  { %986 = vsyncpa [#allocation3], 1 }

</bundles_post_ra>
